<compile_context>
chip_gen: v7x
topology: tpu7x:2x2x1
jax: 0.10.0
libtpu: 0.0.40
codegen_flags: <defaults>
</compile_context>

<pallas_src>
import jax
import jax.numpy as jnp
from jax.experimental import pallas as pl
from jax.experimental.pallas import tpu as pltpu


# Below this size the pallas_call launch overhead dominates the copy; let XLA
# emit (or elide) the copy instead.
_PALLAS_COPY_MIN_BYTES = 1 << 20  # 1 MiB


def _identity_copy_kernel(x_hbm_ref, o_hbm_ref, copy_sem):
    """Single whole-array HBM->HBM DMA: the entire materializing forward."""
    cp = pltpu.make_async_copy(x_hbm_ref, o_hbm_ref, copy_sem)
    cp.start()
    cp.wait()


def _identity_pallas_copy(x: jax.Array) -> jax.Array:
    """Materializing identity as one HBM->HBM DMA (no grid, no VMEM tiles)."""
    return pl.pallas_call(
        _identity_copy_kernel,
        out_shape=jax.ShapeDtypeStruct(x.shape, x.dtype),
        # Leave both operands in HBM: no auto-pipelined VMEM round trip.
        in_specs=[pl.BlockSpec(memory_space=pl.ANY)],
        out_specs=pl.BlockSpec(memory_space=pl.ANY),
        scratch_shapes=[pltpu.SemaphoreType.DMA(())],
    )(x)


def identity(x: jax.Array, *, materialize: bool = False) -> jax.Array:
    """Pallas-backed nn.Identity.

    Default (hot) path: return the input unchanged — zero bytes moved, zero
    launch overhead, matching `forward(self, input): return input`.

    materialize=True: return a fresh output buffer.  Tiny inputs use an XLA
    copy (launch-overhead-bound regime); large inputs use the single
    whole-array HBM->HBM DMA Pallas kernel (bandwidth-bound regime).
    """
    if not materialize:
        return x
    if x.size * x.dtype.itemsize < _PALLAS_COPY_MIN_BYTES:
        return jnp.copy(x)
    return _identity_pallas_copy(x)


if __name__ == "__main__":
    key = jax.random.PRNGKey(0)
    k1, k2 = jax.random.split(key)

    # Small shape consistent with the nn.Identity docstring example
    # (torch.randn(128, 20)), plus a second dtype/shape to show the kernel is
    # shape/dtype/layout agnostic.
    x = jax.random.normal(k1, (128, 20), dtype=jnp.float32)
    x2 = jax.random.normal(k2, (8, 128), dtype=jnp.float32).astype(jnp.bfloat16)

    # 1) Hot-path wrapper: true zero-copy identity.
    y_fast = identity(x)
    jax.block_until_ready(y_fast)
    assert y_fast.shape == x.shape and y_fast.dtype == x.dtype
    assert jnp.array_equal(y_fast, x), "zero-copy identity mismatch"

    # 2) Explicitly exercise the Pallas DMA kernel once (bypassing the
    #    small-shape dispatch so the kernel itself is compiled and run).
    y_kernel = _identity_pallas_copy(x)
    jax.block_until_ready(y_kernel)
    assert y_kernel.shape == x.shape and y_kernel.dtype == x.dtype
    assert jnp.array_equal(y_kernel, x), "Pallas DMA identity mismatch (f32)"

    y_kernel2 = _identity_pallas_copy(x2)
    jax.block_until_ready(y_kernel2)
    assert y_kernel2.shape == x2.shape and y_kernel2.dtype == x2.dtype
    assert jnp.array_equal(y_kernel2, x2), "Pallas DMA identity mismatch (bf16)"

    # 3) Materializing wrapper path (tiny shape -> XLA copy, still correct).
    y_mat = identity(x, materialize=True)
    jax.block_until_ready(y_mat)
    assert jnp.array_equal(y_mat, x), "materializing identity mismatch"

    print("KERNEL_OK")
</pallas_src>

<mosaic_0001>
module attributes {stable_mosaic.version = 11 : i64} {
  func.func @_identity_copy_kernel(%arg0: memref<128x20xf32, #tpu.memory_space<any>>, %arg1: memref<128x20xf32, #tpu.memory_space<any>>, %arg2: memref<!tpu.dma_semaphore, #tpu.memory_space<semaphore_mem>>) attributes {dimension_semantics = [], scalar_prefetch = 0 : i64, scratch_operands = 1 : i64, tpu.core_type = #tpu.core_type<tc>} {
    tpu.enqueue_dma source(%arg0 : memref<128x20xf32, #tpu.memory_space<any>>) target(%arg1 : memref<128x20xf32, #tpu.memory_space<any>>) target_semaphore(%arg2 : memref<!tpu.dma_semaphore, #tpu.memory_space<semaphore_mem>>)
    tpu.wait_dma2 semaphore(%arg2 : memref<!tpu.dma_semaphore, #tpu.memory_space<semaphore_mem>>) src(%arg0 : memref<128x20xf32, #tpu.memory_space<any>>) dst(%arg1 : memref<128x20xf32, #tpu.memory_space<any>>)
    return
  }
}

</mosaic_0001>

<bundles_post_ra>
// kernel: tpu_custom_call.1
= control target key start
LH: loop header
LB: loop body
LE: loop exit
PB: predicated region body
PF: predicated region fallthrough
CT: control target
= control target key end

     0   :  { %s204_s0 = inlined_call_operand.vmem [shape: f32[128,20], index: 0, kind: input, shape index: {}]   ;;  %s205_s1 = inlined_call_operand.vmem [shape: f32[128,20], index: 1, kind: output, shape index: {}]  }
   0x1   :  { %v38_v0 = vld [vmem:[%s204_s0] sm:$0xff]  ;;  %v40_v1 = vld [vmem:[%s204_s0 + $0x8] sm:$0xff]  ;;  %v42_v2 = vld [vmem:[%s204_s0 + $0x10] sm:$0xff] }
   0x2   :  { %39 = vst [vmem:[%s205_s1] sm:$0xff] %v38_v0  ;;  %41 = vst [vmem:[%s205_s1 + $0x8] sm:$0xff] %v40_v1  ;;  %v44_v3 = vld [vmem:[%s204_s0 + $0x18] sm:$0xff]  ;;  %v46_v4 = vld [vmem:[%s204_s0 + $0x20] sm:$0xff] }
   0x3   :  { %43 = vst [vmem:[%s205_s1 + $0x10] sm:$0xff] %v42_v2  ;;  %v48_v5 = vld [vmem:[%s204_s0 + $0x28] sm:$0xff]  ;;  %45 = vst [vmem:[%s205_s1 + $0x18] sm:$0xff] %v44_v3  ;;  %v50_v6 = vld [vmem:[%s204_s0 + $0x30] sm:$0xff] }
   0x4   :  { %47 = vst [vmem:[%s205_s1 + $0x20] sm:$0xff] %v46_v4  ;;  %49 = vst [vmem:[%s205_s1 + $0x28] sm:$0xff] %v48_v5  ;;  %v52_v7 = vld [vmem:[%s204_s0 + $0x38] sm:$0xff]  ;;  %v54_v8 = vld [vmem:[%s204_s0 + $0x40] sm:$0xff] }
   0x5   :  { %51 = vst [vmem:[%s205_s1 + $0x30] sm:$0xff] %v50_v6  ;;  %53 = vst [vmem:[%s205_s1 + $0x38] sm:$0xff] %v52_v7  ;;  %v56_v9 = vld [vmem:[%s204_s0 + $0x48] sm:$0xff]  ;;  %v58_v10 = vld [vmem:[%s204_s0 + $0x50] sm:$0xff] }
   0x6   :  { %55 = vst [vmem:[%s205_s1 + $0x40] sm:$0xff] %v54_v8  ;;  %v60_v11 = vld [vmem:[%s204_s0 + $0x58] sm:$0xff]  ;;  %57 = vst [vmem:[%s205_s1 + $0x48] sm:$0xff] %v56_v9  ;;  %v62_v12 = vld [vmem:[%s204_s0 + $0x60] sm:$0xff] }
   0x7   :  { %59 = vst [vmem:[%s205_s1 + $0x50] sm:$0xff] %v58_v10  ;;  %61 = vst [vmem:[%s205_s1 + $0x58] sm:$0xff] %v60_v11  ;;  %v64_v13 = vld [vmem:[%s204_s0 + $0x68] sm:$0xff]  ;;  %v66_v14 = vld [vmem:[%s204_s0 + $0x70] sm:$0xff] }
   0x8   :  { %63 = vst [vmem:[%s205_s1 + $0x60] sm:$0xff] %v62_v12  ;;  %65 = vst [vmem:[%s205_s1 + $0x68] sm:$0xff] %v64_v13  ;;  %v68_v15 = vld [vmem:[%s204_s0 + $0x78] sm:$0xff] }
   0x9   :  { %67 = vst [vmem:[%s205_s1 + $0x70] sm:$0xff] %v66_v14  ;;  %69 = vst [vmem:[%s205_s1 + $0x78] sm:$0xff] %v68_v15 }
   0xa   :  { %77 = vsyncadd [#allocation2], 2048 }
   0xb   :  { %96 = dma.done.wait [#allocation2], 2048 }
   0xc   :  { %97 = vsyncadd [#allocation2], 4294965248 }
   0xd   :  { %81 = vsyncmov [#allocation2] }
  0x10   :  { %s82_s12 = vpop.sfrf %81 }
  0x11   :  { %p95_p0 = scmp.ne.s32.totalorder %s82_s12, 0 }
  0x13   :  { %86 = shalt.err (%p95_p0)  }

</bundles_post_ra>
